<compile_context>
chip_gen: v7x
topology: tpu7x:2x2x1
jax: 0.10.0
libtpu: 0.0.40
codegen_flags: <defaults>
</compile_context>

<pallas_src>
import functools

import jax
import jax.numpy as jnp
from jax.experimental import pallas as pl
from jax.experimental.pallas import tpu as pltpu


def _round_up(n, m):
    return ((n + m - 1) // m) * m


# ----------------------------------------------------------------------------
# Fused Pallas kernel: full VAE forward for one batch tile.
# ----------------------------------------------------------------------------
def _vae_fused_kernel(*refs, n_enc, n_dec, lat_pad):
    """refs layout:
         inputs : x, eps, (w,b)*n_enc, w_heads, b_heads, (w,b)*n_dec
         outputs: xx, heads (= [mean | logstd] concatenated on lanes)
    """
    it = iter(refs)
    x_ref = next(it)
    eps_ref = next(it)
    enc = [(next(it), next(it)) for _ in range(n_enc)]
    wh_ref, bh_ref = next(it), next(it)
    dec = [(next(it), next(it)) for _ in range(n_dec)]
    xx_ref, heads_ref = next(it), next(it)

    # Encoder hidden stack (unrolled at trace time; activations stay on-chip).
    # Only the matmul operand is cast to the weight dtype (bf16 by default);
    # bias add / ReLU stay f32 (v5e VPU has no bf16; accuracy for free).
    h = x_ref[...]
    for w_ref, b_ref in enc:
        y = jnp.dot(h.astype(w_ref.dtype), w_ref[...],
                    preferred_element_type=jnp.float32)
        h = jnp.maximum(y + b_ref[...], 0.0)

    # Fused mean/logstd heads: one matmul into [TB, 2*lat_pad], one wide store.
    heads = jnp.dot(h.astype(wh_ref.dtype), wh_ref[...],
                    preferred_element_type=jnp.float32) + bh_ref[...]
    heads_ref[...] = heads.astype(heads_ref.dtype)

    # Reparameterization trick: z = mean + eps * exp(logstd)  (exp -> EUP slot).
    # Slice at a 128-lane boundary (lat_pad is a multiple of 128).
    mean = heads[:, :lat_pad]
    logstd = heads[:, lat_pad:]
    z = mean + eps_ref[...] * jnp.exp(logstd)

    # Decoder stack: ReLU hidden layers, sigmoid on the last layer.
    for li, (w_ref, b_ref) in enumerate(dec):
        y = jnp.dot(z.astype(w_ref.dtype), w_ref[...],
                    preferred_element_type=jnp.float32) + b_ref[...]
        z = jax.nn.sigmoid(y) if li == n_dec - 1 else jnp.maximum(y, 0.0)
    xx_ref[...] = z.astype(xx_ref.dtype)


# ----------------------------------------------------------------------------
# One-time weight preparation (hoisted out of the per-call path).
# ----------------------------------------------------------------------------
def prepare_vae_params(params, net_list, compute_dtype=jnp.bfloat16):
    """Pads weights to lane-dense shapes, casts matmul operands to
    `compute_dtype`, fuses the mean/logstd heads, keeps biases in f32.
    Call ONCE; reuse the returned pytree for every forward call."""
    d = len(net_list)
    assert d >= 2
    dims_pad = [_round_up(n, 128) for n in net_list]
    lat_pad = dims_pad[-1]

    def pad_w(w, r, c):
        return jnp.pad(w, ((0, r - w.shape[0]),
                           (0, c - w.shape[1]))).astype(compute_dtype)

    def pad_b(b, c):
        # Biases stay f32: they are added to the f32 accumulator.
        return jnp.pad(b, (0, c - b.shape[0])).reshape(1, c).astype(jnp.float32)

    enc = []
    for i in range(d - 2):
        w, b = params["linear_enc" + str(i + 1)]
        enc.append((pad_w(w, dims_pad[i], dims_pad[i + 1]),
                    pad_b(b, dims_pad[i + 1])))

    # Fused mean/logstd heads: concat along D_out -> a single MXU matmul.
    wm, bm = params["linear_enc" + str(d) + "_mean"]
    ws, bs = params["linear_enc" + str(d) + "_std"]
    wh = jnp.concatenate([pad_w(wm, dims_pad[d - 2], lat_pad),
                          pad_w(ws, dims_pad[d - 2], lat_pad)], axis=1)
    bh = jnp.concatenate([pad_b(bm, lat_pad), pad_b(bs, lat_pad)], axis=1)

    dec = []
    for i in reversed(range(d - 1)):  # execution order: dec(d-1), ..., dec1
        w, b = params["linear_dec" + str(i + 1)]
        dec.append((pad_w(w, dims_pad[i + 1], dims_pad[i]),
                    pad_b(b, dims_pad[i])))

    return dict(net_list=tuple(net_list), dims_pad=tuple(dims_pad),
                enc=enc, heads=(wh, bh), dec=dec)


# ----------------------------------------------------------------------------
# Forward wrapper: pad x/eps, single pallas_call, slice padding off.
# ----------------------------------------------------------------------------
def vae_forward(prep, x, eps, *, batch_block=None):
    net_list = prep["net_list"]
    dims_pad = prep["dims_pad"]
    d = len(net_list)
    lat, lat_pad = net_list[-1], dims_pad[-1]
    n_enc, n_dec = d - 2, d - 1
    B = x.shape[0]
    wh, bh = prep["heads"]

    # ---- VMEM accounting (per batch row of the double-buffered, batch-tiled
    #      streams) and resident weight bytes. Budget fits v7x's 32 MiB scoped
    #      default / 64 MiB physical with headroom.
    itemsize = 4
    row_bytes = 2 * itemsize * (dims_pad[0] + lat_pad          # x, eps inputs
                                + dims_pad[0] + 2 * lat_pad)   # xx, heads outs
    row_bytes += 2 * itemsize * max(dims_pad)                  # activation slack
    weight_bytes = 0
    for w, b in list(prep["enc"]) + [(wh, bh)] + list(prep["dec"]):
        weight_bytes += int(w.size) * w.dtype.itemsize
        weight_bytes += int(b.size) * b.dtype.itemsize
    weight_bytes *= 2  # default double-buffered
    budget = max(1 << 20, (24 << 20) - weight_bytes)

    # ---- Batch tile: grid=(1,) when the batch fits the budget; >= 2 parallel
    #      steps for large batches so v7x's two TensorCores both get work.
    B8 = _round_up(B, 8)
    if batch_block is not None:
        TB = min(B8, _round_up(batch_block, 8))
    else:
        tb_fit = max(8, (budget // row_bytes) // 8 * 8)
        TB = min(B8, tb_fit)
        if TB >= B8 and B8 >= 512:
            TB = _round_up(pl.cdiv(B8, 2), 8)   # 2 even parallel steps (v7x)
    B_pad = _round_up(B, TB)
    grid = (B_pad // TB,)

    # ---- Pad activations (kept f32).
    xp = jnp.pad(x, ((0, B_pad - B), (0, dims_pad[0] - net_list[0])))
    epsp = jnp.pad(eps, ((0, B_pad - B), (0, lat_pad - lat)))

    inputs = [xp, epsp]
    in_specs = [pl.BlockSpec((TB, dims_pad[0]), lambda i: (i, 0)),
                pl.BlockSpec((TB, lat_pad), lambda i: (i, 0))]

    def add_wb(w, b):
        inputs.append(w)
        in_specs.append(pl.BlockSpec(w.shape, lambda i: (0, 0)))
        inputs.append(b)
        in_specs.append(pl.BlockSpec(b.shape, lambda i: (0, 0)))

    for w, b in prep["enc"]:
        add_wb(w, b)
    add_wb(wh, bh)
    for w, b in prep["dec"]:
        add_wb(w, b)

    out_shape = (
        jax.ShapeDtypeStruct((B_pad, dims_pad[0]), jnp.float32),
        jax.ShapeDtypeStruct((B_pad, 2 * lat_pad), jnp.float32),
    )
    out_specs = (
        pl.BlockSpec((TB, dims_pad[0]), lambda i: (i, 0)),
        pl.BlockSpec((TB, 2 * lat_pad), lambda i: (i, 0)),
    )

    # Advisory cost model for XLA scheduling.
    flops = sum(2 * B_pad * dims_pad[i] * dims_pad[i + 1] for i in range(n_enc))
    flops += 2 * B_pad * dims_pad[d - 2] * (2 * lat_pad)
    flops += sum(2 * B_pad * dims_pad[i + 1] * dims_pad[i] for i in range(n_dec))
    transc = B_pad * lat_pad + B_pad * dims_pad[0]
    bytes_acc = sum(int(a.size) * a.dtype.itemsize for a in inputs)
    bytes_acc += sum(int(s.size) * 4 for s in out_shape)

    vmem_need = weight_bytes + TB * row_bytes
    vmem_limit = int(min(64 << 20, max(2 * vmem_need, 32 << 20)))

    kernel = functools.partial(_vae_fused_kernel, n_enc=n_enc, n_dec=n_dec,
                               lat_pad=lat_pad)

    # NOTE: eps could instead be generated in-kernel (pltpu.prng_seed +
    # pltpu.stateful_normal) to drop an input stream; kept external so the
    # forward stays deterministic and comparable to the reference.
    xx_p, heads_p = pl.pallas_call(
        kernel,
        out_shape=out_shape,
        grid=grid,
        in_specs=in_specs,
        out_specs=out_specs,
        compiler_params=pltpu.CompilerParams(
            dimension_semantics=("parallel",),
            vmem_limit_bytes=vmem_limit),
        cost_estimate=pl.CostEstimate(
            flops=int(flops), transcendentals=int(transc),
            bytes_accessed=int(bytes_acc)),
    )(*inputs)

    xx = xx_p[:B, :net_list[0]]
    mean = heads_p[:B, :lat]
    logstd = heads_p[:B, lat_pad:lat_pad + lat]
    return xx, mean, logstd


# ----------------------------------------------------------------------------
# Parameter construction (mimics torch.nn.Linear init, weights stored [in,out])
# ----------------------------------------------------------------------------
def init_vae_params(key, net_list):
    d = len(net_list)
    assert d >= 2
    params = {}

    def make_linear(key, fan_in, fan_out):
        kw, kb = jax.random.split(key)
        bound = 1.0 / jnp.sqrt(fan_in)
        w = jax.random.uniform(kw, (fan_in, fan_out), jnp.float32, -bound, bound)
        b = jax.random.uniform(kb, (fan_out,), jnp.float32, -bound, bound)
        return w, b

    keys = jax.random.split(key, 2 * d)
    ki = 0
    for i in range(d - 2):
        params["linear_enc" + str(i + 1)] = make_linear(
            keys[ki], net_list[i], net_list[i + 1]); ki += 1
    params["linear_enc" + str(d) + "_mean"] = make_linear(
        keys[ki], net_list[d - 2], net_list[d - 1]); ki += 1
    params["linear_enc" + str(d) + "_std"] = make_linear(
        keys[ki], net_list[d - 2], net_list[d - 1]); ki += 1
    for i in reversed(range(d - 1)):
        params["linear_dec" + str(i + 1)] = make_linear(
            keys[ki], net_list[i + 1], net_list[i]); ki += 1
    return params


# ----------------------------------------------------------------------------
# Pure-JAX reference
# ----------------------------------------------------------------------------
def vae_forward_ref(params, net_list, x, eps):
    d = len(net_list)
    h = x
    for i in range(d - 2):
        w, b = params["linear_enc" + str(i + 1)]
        h = jax.nn.relu(h @ w + b)
    wm, bm = params["linear_enc" + str(d) + "_mean"]
    ws, bs = params["linear_enc" + str(d) + "_std"]
    mean = h @ wm + bm
    logstd = h @ ws + bs
    z = mean + eps * jnp.exp(logstd)
    for i in reversed(range(1, d - 1)):
        w, b = params["linear_dec" + str(i + 1)]
        z = jax.nn.relu(z @ w + b)
    w1, b1 = params["linear_dec1"]
    xx = jax.nn.sigmoid(z @ w1 + b1)
    return xx, mean, logstd


# ----------------------------------------------------------------------------
if __name__ == "__main__":
    net_list = [32, 16, 8]   # d = 3: one encoder hidden layer, 2 decoder layers
    batch = 8

    key = jax.random.PRNGKey(0)
    kp, kx, ke = jax.random.split(key, 3)

    params = init_vae_params(kp, net_list)
    x = jax.random.normal(kx, (batch, net_list[0]), jnp.float32)
    # eps of torch.randn_like(logstd) — supplied deterministically from JAX.
    eps = jax.random.normal(ke, (batch, net_list[-1]), jnp.float32)

    xx_r, mean_r, logstd_r = vae_forward_ref(params, net_list, x, eps)

    # 1) f32 operand path: exact check (single grid step, fully fused).
    prep_f32 = prepare_vae_params(params, net_list, compute_dtype=jnp.float32)
    xx, mean, logstd = vae_forward(prep_f32, x, eps)
    jax.block_until_ready((xx, mean, logstd))
    assert xx.shape == (batch, net_list[0])
    assert jnp.allclose(xx, xx_r, atol=1e-5, rtol=1e-5)
    assert jnp.allclose(mean, mean_r, atol=1e-5, rtol=1e-5)
    assert jnp.allclose(logstd, logstd_r, atol=1e-5, rtol=1e-5)

    # 2) Batch-grid path (multiple parallel grid steps; padding + slicing).
    B2 = 200
    x2 = jax.random.normal(kx, (B2, net_list[0]), jnp.float32)
    eps2 = jax.random.normal(ke, (B2, net_list[-1]), jnp.float32)
    xx2, mean2, logstd2 = vae_forward(prep_f32, x2, eps2, batch_block=64)
    jax.block_until_ready((xx2, mean2, logstd2))
    xx2_r, mean2_r, logstd2_r = vae_forward_ref(params, net_list, x2, eps2)
    assert jnp.allclose(xx2, xx2_r, atol=1e-5, rtol=1e-5)
    assert jnp.allclose(mean2, mean2_r, atol=1e-5, rtol=1e-5)
    assert jnp.allclose(logstd2, logstd2_r, atol=1e-5, rtol=1e-5)

    # 3) Default bf16 matmul-operand path (v6e/v7x MXU); x/eps/biases stay f32,
    #    accumulation stays f32 -> much tighter than a full-bf16 path.
    prep_bf16 = prepare_vae_params(params, net_list)  # default bf16 weights
    xxb, meanb, logstdb = vae_forward(prep_bf16, x, eps)
    jax.block_until_ready((xxb, meanb, logstdb))
    assert jnp.allclose(xxb, xx_r, atol=5e-2, rtol=5e-2)
    assert jnp.allclose(meanb, mean_r, atol=5e-2, rtol=5e-2)
    assert jnp.allclose(logstdb, logstd_r, atol=5e-2, rtol=5e-2)

    print("KERNEL_OK")
</pallas_src>

<mosaic_0001>
module attributes {stable_mosaic.version = 11 : i64} {
  func.func @_vae_fused_kernel(%arg0: i32, %arg1: memref<8x128xf32, #tpu.memory_space<vmem>>, %arg2: memref<8x128xf32, #tpu.memory_space<vmem>>, %arg3: memref<128x128xf32, #tpu.memory_space<vmem>>, %arg4: memref<1x128xf32, #tpu.memory_space<vmem>>, %arg5: memref<128x256xf32, #tpu.memory_space<vmem>>, %arg6: memref<1x256xf32, #tpu.memory_space<vmem>>, %arg7: memref<128x128xf32, #tpu.memory_space<vmem>>, %arg8: memref<1x128xf32, #tpu.memory_space<vmem>>, %arg9: memref<128x128xf32, #tpu.memory_space<vmem>>, %arg10: memref<1x128xf32, #tpu.memory_space<vmem>>, %arg11: memref<8x128xf32, #tpu.memory_space<vmem>>, %arg12: memref<8x256xf32, #tpu.memory_space<vmem>>) attributes {dimension_semantics = [#tpu.dimension_semantics<parallel>], iteration_bounds = array<i64: 1>, scalar_prefetch = 0 : i64, scratch_operands = 0 : i64, tpu.core_type = #tpu.core_type<tc>, window_params = [{transform_indices = @transform_0, window_bounds = array<i64: 8, 128>}, {transform_indices = @transform_1, window_bounds = array<i64: 8, 128>}, {pipeline_mode = #tpu.pipeline_mode<synchronous>, transform_indices = @transform_2, window_bounds = array<i64: 128, 128>}, {pipeline_mode = #tpu.pipeline_mode<synchronous>, transform_indices = @transform_3, window_bounds = array<i64: 1, 128>}, {pipeline_mode = #tpu.pipeline_mode<synchronous>, transform_indices = @transform_4, window_bounds = array<i64: 128, 256>}, {pipeline_mode = #tpu.pipeline_mode<synchronous>, transform_indices = @transform_5, window_bounds = array<i64: 1, 256>}, {pipeline_mode = #tpu.pipeline_mode<synchronous>, transform_indices = @transform_6, window_bounds = array<i64: 128, 128>}, {pipeline_mode = #tpu.pipeline_mode<synchronous>, transform_indices = @transform_7, window_bounds = array<i64: 1, 128>}, {pipeline_mode = #tpu.pipeline_mode<synchronous>, transform_indices = @transform_8, window_bounds = array<i64: 128, 128>}, {pipeline_mode = #tpu.pipeline_mode<synchronous>, transform_indices = @transform_9, window_bounds = array<i64: 1, 128>}, {transform_indices = @transform_10, window_bounds = array<i64: 8, 128>}, {transform_indices = @transform_11, window_bounds = array<i64: 8, 256>}]} {
    %c0 = arith.constant 0 : index
    %c0_0 = arith.constant 0 : index
    %0 = vector.load %arg1[%c0, %c0_0] : memref<8x128xf32, #tpu.memory_space<vmem>>, vector<8x128xf32>
    %c0_1 = arith.constant 0 : index
    %c0_2 = arith.constant 0 : index
    %1 = vector.load %arg3[%c0_1, %c0_2] : memref<128x128xf32, #tpu.memory_space<vmem>>, vector<128x128xf32>
    %cst = arith.constant dense<0.000000e+00> : vector<8x128xf32>
    %2 = tpu.matmul %0, %1, %cst {dimension_numbers = #tpu.dot_dimension_numbers<[1], [0], [0], [1], [0, 0, 1, 1], [], []>} : vector<8x128xf32>, vector<128x128xf32>, vector<8x128xf32> -> vector<8x128xf32>
    %c0_3 = arith.constant 0 : index
    %c0_4 = arith.constant 0 : index
    %3 = vector.load %arg4[%c0_3, %c0_4] : memref<1x128xf32, #tpu.memory_space<vmem>>, vector<1x128xf32>
    %4 = vector.broadcast %3 : vector<1x128xf32> to vector<8x128xf32>
    %5 = arith.addf %2, %4 : vector<8x128xf32>
    %cst_5 = arith.constant 0.000000e+00 : f32
    %6 = vector.broadcast %cst_5 : f32 to vector<8x128xf32>
    %7 = arith.maximumf %5, %6 : vector<8x128xf32>
    %c0_6 = arith.constant 0 : index
    %c0_7 = arith.constant 0 : index
    %8 = vector.load %arg5[%c0_6, %c0_7] : memref<128x256xf32, #tpu.memory_space<vmem>>, vector<128x256xf32>
    %cst_8 = arith.constant dense<0.000000e+00> : vector<8x256xf32>
    %9 = tpu.matmul %7, %8, %cst_8 {dimension_numbers = #tpu.dot_dimension_numbers<[1], [0], [0], [1], [0, 0, 1, 1], [], []>} : vector<8x128xf32>, vector<128x256xf32>, vector<8x256xf32> -> vector<8x256xf32>
    %c0_9 = arith.constant 0 : index
    %c0_10 = arith.constant 0 : index
    %10 = vector.load %arg6[%c0_9, %c0_10] : memref<1x256xf32, #tpu.memory_space<vmem>>, vector<1x256xf32>
    %11 = vector.broadcast %10 : vector<1x256xf32> to vector<8x256xf32>
    %12 = arith.addf %9, %11 : vector<8x256xf32>
    %c0_11 = arith.constant 0 : index
    %c0_12 = arith.constant 0 : index
    %13 = vector.load %arg12[%c0_11, %c0_12] : memref<8x256xf32, #tpu.memory_space<vmem>>, vector<8x256xf32>
    tpu.vector_store %arg12[%c0_11, %c0_12], %12 {strides = array<i32>} : memref<8x256xf32, #tpu.memory_space<vmem>>, vector<8x256xf32>,
    %14 = vector.extract_strided_slice %12 {offsets = [0, 0], sizes = [8, 128], strides = [1, 1]} : vector<8x256xf32> to vector<8x128xf32>
    %15 = vector.extract_strided_slice %12 {offsets = [0, 128], sizes = [8, 128], strides = [1, 1]} : vector<8x256xf32> to vector<8x128xf32>
    %c0_13 = arith.constant 0 : index
    %c0_14 = arith.constant 0 : index
    %16 = vector.load %arg2[%c0_13, %c0_14] : memref<8x128xf32, #tpu.memory_space<vmem>>, vector<8x128xf32>
    %17 = math.exp %15 : vector<8x128xf32>
    %18 = arith.mulf %16, %17 : vector<8x128xf32>
    %19 = arith.addf %14, %18 : vector<8x128xf32>
    %c0_15 = arith.constant 0 : index
    %c0_16 = arith.constant 0 : index
    %20 = vector.load %arg7[%c0_15, %c0_16] : memref<128x128xf32, #tpu.memory_space<vmem>>, vector<128x128xf32>
    %cst_17 = arith.constant dense<0.000000e+00> : vector<8x128xf32>
    %21 = tpu.matmul %19, %20, %cst_17 {dimension_numbers = #tpu.dot_dimension_numbers<[1], [0], [0], [1], [0, 0, 1, 1], [], []>} : vector<8x128xf32>, vector<128x128xf32>, vector<8x128xf32> -> vector<8x128xf32>
    %c0_18 = arith.constant 0 : index
    %c0_19 = arith.constant 0 : index
    %22 = vector.load %arg8[%c0_18, %c0_19] : memref<1x128xf32, #tpu.memory_space<vmem>>, vector<1x128xf32>
    %23 = vector.broadcast %22 : vector<1x128xf32> to vector<8x128xf32>
    %24 = arith.addf %21, %23 : vector<8x128xf32>
    %cst_20 = arith.constant 0.000000e+00 : f32
    %25 = vector.broadcast %cst_20 : f32 to vector<8x128xf32>
    %26 = arith.maximumf %24, %25 : vector<8x128xf32>
    %c0_21 = arith.constant 0 : index
    %c0_22 = arith.constant 0 : index
    %27 = vector.load %arg9[%c0_21, %c0_22] : memref<128x128xf32, #tpu.memory_space<vmem>>, vector<128x128xf32>
    %cst_23 = arith.constant dense<0.000000e+00> : vector<8x128xf32>
    %28 = tpu.matmul %26, %27, %cst_23 {dimension_numbers = #tpu.dot_dimension_numbers<[1], [0], [0], [1], [0, 0, 1, 1], [], []>} : vector<8x128xf32>, vector<128x128xf32>, vector<8x128xf32> -> vector<8x128xf32>
    %c0_24 = arith.constant 0 : index
    %c0_25 = arith.constant 0 : index
    %29 = vector.load %arg10[%c0_24, %c0_25] : memref<1x128xf32, #tpu.memory_space<vmem>>, vector<1x128xf32>
    %30 = vector.broadcast %29 : vector<1x128xf32> to vector<8x128xf32>
    %31 = arith.addf %28, %30 : vector<8x128xf32>
    %32 = arith.negf %31 : vector<8x128xf32>
    %33 = math.exp %32 : vector<8x128xf32>
    %cst_26 = arith.constant 1.000000e+00 : f32
    %34 = vector.broadcast %cst_26 : f32 to vector<8x128xf32>
    %35 = arith.addf %34, %33 : vector<8x128xf32>
    %36 = arith.divf %34, %35 : vector<8x128xf32>
    %c0_27 = arith.constant 0 : index
    %c0_28 = arith.constant 0 : index
    %37 = vector.load %arg11[%c0_27, %c0_28] : memref<8x128xf32, #tpu.memory_space<vmem>>, vector<8x128xf32>
    tpu.vector_store %arg11[%c0_27, %c0_28], %36 {strides = array<i32>} : memref<8x128xf32, #tpu.memory_space<vmem>>, vector<8x128xf32>,
    return
  }
  func.func @transform_0(%arg0: i32) -> (i32, i32) {
    %c0_i32 = arith.constant 0 : i32
    %c0_i32_0 = arith.constant 0 : i32
    return %arg0, %c0_i32 : i32, i32
  }
  func.func @transform_1(%arg0: i32) -> (i32, i32) {
    %c0_i32 = arith.constant 0 : i32
    %c0_i32_0 = arith.constant 0 : i32
    return %arg0, %c0_i32 : i32, i32
  }
  func.func @transform_2(%arg0: i32) -> (i32, i32) {
    %c0_i32 = arith.constant 0 : i32
    %c0_i32_0 = arith.constant 0 : i32
    %c0_i32_1 = arith.constant 0 : i32
    return %c0_i32, %c0_i32_0 : i32, i32
  }
  func.func @transform_3(%arg0: i32) -> (i32, i32) {
    %c0_i32 = arith.constant 0 : i32
    %c0_i32_0 = arith.constant 0 : i32
    %c0_i32_1 = arith.constant 0 : i32
    return %c0_i32, %c0_i32_0 : i32, i32
  }
  func.func @transform_4(%arg0: i32) -> (i32, i32) {
    %c0_i32 = arith.constant 0 : i32
    %c0_i32_0 = arith.constant 0 : i32
    %c0_i32_1 = arith.constant 0 : i32
    return %c0_i32, %c0_i32_0 : i32, i32
  }
  func.func @transform_5(%arg0: i32) -> (i32, i32) {
    %c0_i32 = arith.constant 0 : i32
    %c0_i32_0 = arith.constant 0 : i32
    %c0_i32_1 = arith.constant 0 : i32
    return %c0_i32, %c0_i32_0 : i32, i32
  }
  func.func @transform_6(%arg0: i32) -> (i32, i32) {
    %c0_i32 = arith.constant 0 : i32
    %c0_i32_0 = arith.constant 0 : i32
    %c0_i32_1 = arith.constant 0 : i32
    return %c0_i32, %c0_i32_0 : i32, i32
  }
  func.func @transform_7(%arg0: i32) -> (i32, i32) {
    %c0_i32 = arith.constant 0 : i32
    %c0_i32_0 = arith.constant 0 : i32
    %c0_i32_1 = arith.constant 0 : i32
    return %c0_i32, %c0_i32_0 : i32, i32
  }
  func.func @transform_8(%arg0: i32) -> (i32, i32) {
    %c0_i32 = arith.constant 0 : i32
    %c0_i32_0 = arith.constant 0 : i32
    %c0_i32_1 = arith.constant 0 : i32
    return %c0_i32, %c0_i32_0 : i32, i32
  }
  func.func @transform_9(%arg0: i32) -> (i32, i32) {
    %c0_i32 = arith.constant 0 : i32
    %c0_i32_0 = arith.constant 0 : i32
    %c0_i32_1 = arith.constant 0 : i32
    return %c0_i32, %c0_i32_0 : i32, i32
  }
  func.func @transform_10(%arg0: i32) -> (i32, i32) {
    %c0_i32 = arith.constant 0 : i32
    %c0_i32_0 = arith.constant 0 : i32
    return %arg0, %c0_i32 : i32, i32
  }
  func.func @transform_11(%arg0: i32) -> (i32, i32) {
    %c0_i32 = arith.constant 0 : i32
    %c0_i32_0 = arith.constant 0 : i32
    return %arg0, %c0_i32 : i32, i32
  }
}

</mosaic_0001>

<bundles_post_ra>
// kernel: tpu_custom_call.1
= control target key start
LH: loop header
LB: loop body
LE: loop exit
PB: predicated region body
PF: predicated region fallthrough
CT: control target
= control target key end

     0   :  { %17 = vsyncpa [#allocation3], 0  ;;  %s1277_s0 = inlined_call_operand.hbm [shape: f32[8,128], index: 0, kind: input, shape index: {}]   ;;  %s1278_s1 = inlined_call_operand.hbm [shape: f32[8,128], index: 1, kind: input, shape index: {}]   ;;  %s1279_s2 = inlined_call_operand.hbm [shape: f32[128,128], index: 2, kind: input, shape index: {}]   ;;  %s1280_s3 = inlined_call_operand.vmem [shape: f32[1,128], index: 3, kind: input, shape index: {}]   ;;  %s1281_s4 = inlined_call_operand.hbm [shape: f32[128,256], index: 4, kind: input, shape index: {}]   ;;  %s1282_s5 = inlined_call_operand.vmem [shape: f32[1,256], index: 5, kind: input, shape index: {}]   ;;  %s1283_s6 = inlined_call_operand.hbm [shape: f32[128,128], index: 6, kind: input, shape index: {}]   ;;  %s1284_s7 = inlined_call_operand.vmem [shape: f32[1,128], index: 7, kind: input, shape index: {}]   ;;  %s1285_s8 = inlined_call_operand.hbm [shape: f32[128,128], index: 8, kind: input, shape index: {}]   ;;  %s1286_s9 = inlined_call_operand.vmem [shape: f32[1,128], index: 9, kind: input, shape index: {}]   ;;  %s1287_s10 = inlined_call_operand.hbm [shape: f32[8,128], index: 10, kind: output, shape index: {0}]   ;;  %s1288_s11 = inlined_call_operand.hbm [shape: f32[8,256], index: 11, kind: output, shape index: {1}]  }
   0x1   :  { %18 = vsyncpa [#allocation6], 0 }
   0x2   :  { %19 = vsyncpa [#allocation9], 0 }
   0x3   :  { %20 = vsyncpa [#allocation12], 0 }
   0x4   :  { %21 = vsyncpa [#allocation4], 0 }
   0x5   :  { %22 = vsyncpa [#allocation15], 0  ;;  %s1033_s17 = smov [#allocation5]   ;;  %s1034_s19 = smov [#allocation8]  }
   0x6   :  { %s39_s18 = sshll.u32 %s1033_s17, 4  ;;  %s62_s20 = sshll.u32 %s1034_s19, 4  ;;  %s40_s18 = int_to_ptr.vmem [resolvable:$true] %s39_s18  ;;  %s1108_s20 = int_to_ptr.vmem [resolvable:$true] %s62_s20 }
   0x7   :  { %s845_s23 = scalar_lea.hbm %s1278_s1, 128 }
   0x8   :  { %p846_p0 = scmp.ne.s32.totalorder %s1278_s1, %s845_s23  ;;  %p849_p1 = scmp.lt.u32.totalorder %s845_s23, %s1278_s1 }
   0xa   :  { %p851_p2 = pnand %p849_p1, %p846_p0 }
   0xc   :  { %854 = shalt.err (!%p851_p2)
}
   0xd   :  { %s855_s28 = scalar_lea.vmem %s40_s18, 128  ;;  %p860_p4 = scmp.lt.s32.totalorder %s40_s18, %s40_s18 }
   0xe   :  { %p856_p3 = scmp.ne.s32.totalorder %s40_s18, %s855_s28  ;;  %p861_p5 = scmp.lt.s32.totalorder %s855_s28, %s855_s28 }
  0x10   :  { %p862_p6 = por %p861_p5, %p860_p4 }
  0x12   :  { %p863_p7 = pnand %p862_p6, %p856_p3 }
  0x14   :  { %866 = shalt.err (!%p863_p7)
}
  0x15   :  { %42 = dma.hbm_to_vmem [thread:$0]  %s1278_s1, 128, %s40_s18, [#allocation6]  }
  0x16   :  { %s867_s14 = scalar_lea.hbm %s1281_s4, 4096 }
  0x17   :  { %p868_p8 = scmp.ne.s32.totalorder %s1281_s4, %s867_s14  ;;  %p871_p9 = scmp.lt.u32.totalorder %s867_s14, %s1281_s4 }
  0x19   :  { %p873_p10 = pnand %p871_p9, %p868_p8 }
  0x1b   :  { %876 = shalt.err (!%p873_p10)
}
  0x1c   :  { %s877_s21 = scalar_lea.vmem %s1108_s20, 4096  ;;  %p882_p12 = scmp.lt.s32.totalorder %s1108_s20, %s1108_s20 }
  0x1d   :  { %p878_p11 = scmp.ne.s32.totalorder %s1108_s20, %s877_s21  ;;  %p883_p13 = scmp.lt.s32.totalorder %s877_s21, %s877_s21 }
  0x1f   :  { %p884_p0 = por %p883_p13, %p882_p12 }
  0x21   :  { %p885_p1 = pnand %p884_p0, %p878_p11 }
  0x23   :  { %888 = shalt.err (!%p885_p1)
}
  0x24   :  { %s1035_s1 = smov 256   ;;  %s1036_s18 = smov 16  }
  0x25   :  { %68 = dma.hbm_to_vmem [thread:$0]  %s1281_s4, 4096, %s1108_s20, [#allocation9], %s1035_s1, %s1035_s1, %s1036_s18  }
  0x26   :  { %s1037_s24 = smov [#allocation2]   ;;  %s1038_s26 = smov [#allocation7]  }
  0x27   :  { %s29_s25 = sshll.u32 %s1037_s24, 4  ;;  %s48_s27 = sshll.u32 %s1038_s26, 4  ;;  %s30_s25 = int_to_ptr.vmem [resolvable:$true] %s29_s25  ;;  %s1139_s27 = int_to_ptr.vmem [resolvable:$true] %s48_s27 }
  0x28   :  { %s889_s30 = scalar_lea.hbm %s1277_s0, 128 }
  0x29   :  { %p890_p2 = scmp.ne.s32.totalorder %s1277_s0, %s889_s30  ;;  %p893_p3 = scmp.lt.u32.totalorder %s889_s30, %s1277_s0 }
  0x2b   :  { %p895_p4 = pnand %p893_p3, %p890_p2 }
  0x2d   :  { %898 = shalt.err (!%p895_p4)
}
  0x2e   :  { %s899_s4 = scalar_lea.vmem %s30_s25, 128  ;;  %p904_p6 = scmp.lt.s32.totalorder %s30_s25, %s30_s25 }
  0x2f   :  { %p900_p5 = scmp.ne.s32.totalorder %s30_s25, %s899_s4  ;;  %p905_p7 = scmp.lt.s32.totalorder %s899_s4, %s899_s4 }
  0x31   :  { %p906_p8 = por %p905_p7, %p904_p6 }
  0x33   :  { %p907_p9 = pnand %p906_p8, %p900_p5 }
  0x35   :  { %910 = shalt.err (!%p907_p9)
}
  0x36   :  { %32 = dma.hbm_to_vmem [thread:$0]  %s1277_s0, 128, %s30_s25, [#allocation3]  }
  0x37   :  { %s911_s21 = scalar_lea.hbm %s1279_s2, 2048 }
  0x38   :  { %p912_p10 = scmp.ne.s32.totalorder %s1279_s2, %s911_s21  ;;  %p915_p11 = scmp.lt.u32.totalorder %s911_s21, %s1279_s2 }
  0x3a   :  { %p917_p12 = pnand %p915_p11, %p912_p10 }
  0x3c   :  { %920 = shalt.err (!%p917_p12)
}
  0x3d   :  { %s921_s24 = scalar_lea.vmem %s1139_s27, 2048  ;;  %p926_p0 = scmp.lt.s32.totalorder %s1139_s27, %s1139_s27 }
  0x3e   :  { %p922_p13 = scmp.ne.s32.totalorder %s1139_s27, %s921_s24  ;;  %p927_p1 = scmp.lt.s32.totalorder %s921_s24, %s921_s24 }
  0x40   :  { %p928_p2 = por %p927_p1, %p926_p0 }
  0x42   :  { %p929_p3 = pnand %p928_p2, %p922_p13 }
  0x44   :  { %932 = shalt.err (!%p929_p3)
}
  0x45   :  { %s1039_s0 = smov 128   ;;  %s1040_s25 = smov 8  }
  0x46   :  { %54 = dma.hbm_to_vmem [thread:$0]  %s1279_s2, 2048, %s1139_s27, [#allocation6], %s1039_s0, %s1039_s0, %s1040_s25  }
  0x47   :  { %s1041_s29 = smov [#allocation10]   ;;  %s1042_s12 = smov [#allocation11]  }
  0x48   :  { %s76_s30 = sshll.u32 %s1041_s29, 4  ;;  %s90_s13 = sshll.u32 %s1042_s12, 4  ;;  %s77_s30 = int_to_ptr.vmem [resolvable:$true] %s76_s30  ;;  %s1173_s13 = int_to_ptr.vmem [resolvable:$true] %s90_s13 }
  0x49   :  { %s933_s4 = scalar_lea.hbm %s1283_s6, 2048 }
  0x4a   :  { %p934_p4 = scmp.ne.s32.totalorder %s1283_s6, %s933_s4  ;;  %p937_p5 = scmp.lt.u32.totalorder %s933_s4, %s1283_s6 }
  0x4c   :  { %p939_p6 = pnand %p937_p5, %p934_p4 }
  0x4e   :  { %942 = shalt.err (!%p939_p6)
}
  0x4f   :  { %s943_s2 = scalar_lea.vmem %s77_s30, 2048  ;;  %p948_p8 = scmp.lt.s32.totalorder %s77_s30, %s77_s30 }
  0x50   :  { %p944_p7 = scmp.ne.s32.totalorder %s77_s30, %s943_s2  ;;  %p949_p9 = scmp.lt.s32.totalorder %s943_s2, %s943_s2 }
  0x52   :  { %p950_p10 = por %p949_p9, %p948_p8 }
  0x54   :  { %p951_p11 = pnand %p950_p10, %p944_p7 }
  0x56   :  { %954 = shalt.err (!%p951_p11)
}
  0x57   :  { %82 = dma.hbm_to_vmem [thread:$0]  %s1283_s6, 2048, %s77_s30, [#allocation9], %s1039_s0, %s1039_s0, %s1040_s25  }
  0x58   :  { %s955_s22 = scalar_lea.hbm %s1285_s8, 2048 }
  0x59   :  { %p956_p12 = scmp.ne.s32.totalorder %s1285_s8, %s955_s22  ;;  %p959_p13 = scmp.lt.u32.totalorder %s955_s22, %s1285_s8 }
  0x5b   :  { %p961_p0 = pnand %p959_p13, %p956_p12 }
  0x5d   :  { %964 = shalt.err (!%p961_p0)
}
  0x5e   :  { %s965_s29 = scalar_lea.vmem %s1173_s13, 2048  ;;  %p970_p2 = scmp.lt.s32.totalorder %s1173_s13, %s1173_s13 }
  0x5f   :  { %p966_p1 = scmp.ne.s32.totalorder %s1173_s13, %s965_s29  ;;  %p971_p3 = scmp.lt.s32.totalorder %s965_s29, %s965_s29 }
  0x61   :  { %p972_p4 = por %p971_p3, %p970_p2 }
  0x63   :  { %p973_p5 = pnand %p972_p4, %p966_p1 }
  0x65   :  { %976 = shalt.err (!%p973_p5)
}
  0x66   :  { %96 = dma.hbm_to_vmem [thread:$0]  %s1285_s8, 2048, %s1173_s13, [#allocation12], %s1039_s0, %s1039_s0, %s1040_s25  }
  0x67   :  { %1021 = dma.done.wait [#allocation3], 128  }
  0x68   :  { %1022 = vsyncadd [#allocation3], 4294967168 }
  0x69   :  { %1023 = dma.done.wait [#allocation6], 2176  }
  0x6a   :  { %1024 = vsyncadd [#allocation6], 4294965120 }
  0x6b   :  { %1025 = dma.done.wait [#allocation9], 6144  }
  0x6c   :  { %1026 = vsyncadd [#allocation9], 4294961152 }
  0x6d   :  { %1027 = dma.done.wait [#allocation12], 2048  }
  0x6e   :  { %1028 = vsyncadd [#allocation12], 4294965248  ;;  %v1043_v0 = vmov 0.0|0.0   ;;  %vm1044_vm0 = vmmov 0   ;;  %v1045_v1 = vmov 0.0   ;;  %v118_v2 = vld [vmem:[#allocation7] sm:$0xff] }
  0x6f   :  { %720 = vmatprep.subr.bf16.mxu0 %v1043_v0  ;;  %647 = vmatprep.mubr.msk.f32.mxu0 %vm1044_vm0, %v1045_v1  ;;  %v119_v3 = vld [vmem:[#allocation7 + $0x8] sm:$0xff]  ;;  %v120_v4 = vld [vmem:[#allocation7 + $0x10] sm:$0xff]  ;;  %v121_v6 = vld [vmem:[#allocation7 + $0x18] sm:$0xff]  ;;  %s1046_s13 = smov [#allocation14]  }
  0x70   :  { %320 = vmatprep.mubr.f32.mxu1 %v1045_v1  ;;  %v721_v5 = vpack.c.bf16 %v119_v3, %v118_v2  ;;  %v724_v7 = vpack.c.bf16 %v121_v6, %v120_v4  ;;  %v122_v8 = vld [vmem:[#allocation7 + $0x20] sm:$0xff]  ;;  %v123_v9 = vld [vmem:[#allocation7 + $0x28] sm:$0xff]  ;;  %v124_v11 = vld [vmem:[#allocation7 + $0x30] sm:$0xff]  ;;  %s544_s14 = sshll.u32 %s1046_s13, 4  ;;  %s545_s14 = int_to_ptr.vmem [resolvable:$true] %s544_s14 }
  0x71   :  { %v213_v10 = vld [vmem:[#allocation8 + $0x8] sm:$0xff]  ;;  %v125_v12 = vld [vmem:[#allocation7 + $0x38] sm:$0xff]  ;;  %v212_v14 = vld [vmem:[#allocation8] sm:$0xff]  ;;  %v727_v16 = vpack.c.bf16 %v123_v9, %v122_v8  ;;  %s977_s15 = scalar_lea.vmem %s545_s14, 256  ;;  %p982_p7 = scmp.lt.s32.totalorder %s545_s14, %s545_s14 }
  0x72   :  { %722 = vmatpush3.bf16.msra.mxu0 %v721_v5  ;;  %v215_v13 = vld [vmem:[#allocation8 + $0x18] sm:$0xff]  ;;  %v214_v15 = vld [vmem:[#allocation8 + $0x10] sm:$0xff]  ;;  %v217_v19 = vld [vmem:[#allocation8 + $0x28] sm:$0xff]  ;;  %v730_v27 = vpack.c.bf16 %v125_v12, %v124_v11  ;;  %p978_p6 = scmp.ne.s32.totalorder %s545_s14, %s977_s15  ;;  %p983_p8 = scmp.lt.s32.totalorder %s977_s15, %s977_s15 }
  0x73   :  { %723 = vmatprep.subr.bf16.mxu0 %v1043_v0  ;;  %v744_v17 = vpack.c.bf16 %v215_v13, %v213_v10  ;;  %v746_v18 = vpack.c.bf16 %v214_v15, %v212_v14  ;;  %v219_v20 = vld [vmem:[#allocation8 + $0x38] sm:$0xff]  ;;  %v216_v21 = vld [vmem:[#allocation8 + $0x20] sm:$0xff]  ;;  %v218_v23 = vld [vmem:[#allocation8 + $0x30] sm:$0xff] }
  0x74   :  { %v748_v22 = vpack.c.bf16 %v219_v20, %v217_v19  ;;  %v221_v24 = vld [vmem:[#allocation8 + $0x48] sm:$0xff]  ;;  %v223_v25 = vld [vmem:[#allocation8 + $0x58] sm:$0xff]  ;;  %v750_v26 = vpack.c.bf16 %v218_v23, %v216_v21  ;;  %v126_v28 = vld [vmem:[#allocation7 + $0x40] sm:$0xff]  ;;  %p984_p9 = por %p983_p8, %p982_p7 }
  0x75   :  { %745 = vmatprep.subr.bf16.mxu1 %v744_v17  ;;  %v752_v29 = vpack.c.bf16 %v223_v25, %v221_v24  ;;  %v220_v30 = vld [vmem:[#allocation8 + $0x40] sm:$0xff]  ;;  %v222_v31 = vld [vmem:[#allocation8 + $0x50] sm:$0xff]  ;;  %v127_v32 = vld [vmem:[#allocation7 + $0x48] sm:$0xff] }
  0x76   :  { %725 = vmatpush3.bf16.msra.mxu0 %v724_v7  ;;  %747 = vmatpush1.bf16.msra.mxu1 %v746_v18  ;;  %v225_v33 = vld [vmem:[#allocation8 + $0x68] sm:$0xff]  ;;  %v227_v34 = vld [vmem:[#allocation8 + $0x78] sm:$0xff]  ;;  %v754_v35 = vpack.c.bf16 %v222_v31, %v220_v30  ;;  %v733_v36 = vpack.c.bf16 %v127_v32, %v126_v28  ;;  %v128_v37 = vld [vmem:[#allocation7 + $0x50] sm:$0xff]  ;;  %p985_p10 = pnand %p984_p9, %p978_p6 }
  0x77   :  { %726 = vmatprep.subr.bf16.mxu0 %v1043_v0  ;;  %749 = vmatprep.subr.bf16.mxu1 %v748_v22  ;;  %v756_v38 = vpack.c.bf16 %v227_v34, %v225_v33  ;;  %v224_v39 = vld [vmem:[#allocation8 + $0x60] sm:$0xff]  ;;  %v226_v40 = vld [vmem:[#allocation8 + $0x70] sm:$0xff]  ;;  %v129_v41 = vld [vmem:[#allocation7 + $0x58] sm:$0xff] }
  0x78   :  { %v229_v42 = vld [vmem:[#allocation8 + $0x88] sm:$0xff]  ;;  %v231_v43 = vld [vmem:[#allocation8 + $0x98] sm:$0xff]  ;;  %v758_v44 = vpack.c.bf16 %v226_v40, %v224_v39  ;;  %v736_v45 = vpack.c.bf16 %v129_v41, %v128_v37  ;;  %v130_v46 = vld [vmem:[#allocation7 + $0x60] sm:$0xff] }
  0x79   :  { %v760_v47 = vpack.c.bf16 %v231_v43, %v229_v42  ;;  %v228_v48 = vld [vmem:[#allocation8 + $0x80] sm:$0xff]  ;;  %v230_v49 = vld [vmem:[#allocation8 + $0x90] sm:$0xff]  ;;  %v131_v50 = vld [vmem:[#allocation7 + $0x68] sm:$0xff] }
  0x7a   :  { %728 = vmatpush3.bf16.msra.mxu0 %v727_v16  ;;  %751 = vmatpush1.bf16.msra.mxu1 %v750_v26  ;;  %v233_v51 = vld [vmem:[#allocation8 + $0xa8] sm:$0xff]  ;;  %v235_v52 = vld [vmem:[#allocation8 + $0xb8] sm:$0xff]  ;;  %v762_v53 = vpack.c.bf16 %v230_v49, %v228_v48  ;;  %v739_v54 = vpack.c.bf16 %v131_v50, %v130_v46  ;;  %v132_v55 = vld [vmem:[#allocation7 + $0x70] sm:$0xff] }
  0x7b   :  { %729 = vmatprep.subr.bf16.mxu0 %v1043_v0  ;;  %753 = vmatprep.subr.bf16.mxu1 %v752_v29  ;;  %v764_v56 = vpack.c.bf16 %v235_v52, %v233_v51  ;;  %v232_v57 = vld [vmem:[#allocation8 + $0xa0] sm:$0xff]  ;;  %v234_v58 = vld [vmem:[#allocation8 + $0xb0] sm:$0xff]  ;;  %v133_v59 = vld [vmem:[#allocation7 + $0x78] sm:$0xff] }
  0x7c   :  { %v237_v60 = vld [vmem:[#allocation8 + $0xc8] sm:$0xff]  ;;  %v239_v61 = vld [vmem:[#allocation8 + $0xd8] sm:$0xff]  ;;  %v766_v62 = vpack.c.bf16 %v234_v58, %v232_v57  ;;  %v742_v63 = vpack.c.bf16 %v133_v59, %v132_v55  ;;  %v236_v3 = vld [vmem:[#allocation8 + $0xc0] sm:$0xff] }
  0x7d   :  { %v768_v2 = vpack.c.bf16 %v239_v61, %v237_v60  ;;  %v238_v4 = vld [vmem:[#allocation8 + $0xd0] sm:$0xff]  ;;  %v241_v7 = vld [vmem:[#allocation8 + $0xe8] sm:$0xff]  ;;  %v243_v8 = vld [vmem:[#allocation8 + $0xf8] sm:$0xff] }
  0x7e   :  { %731 = vmatpush3.bf16.msra.mxu0 %v730_v27  ;;  %755 = vmatpush1.bf16.msra.mxu1 %v754_v35  ;;  %v770_v5 = vpack.c.bf16 %v238_v4, %v236_v3  ;;  %v117_v6 = vld [vmem:[#allocation2] sm:$0xff]  ;;  %v772_v9 = vpack.c.bf16 %v243_v8, %v241_v7  ;;  %v240_v10 = vld [vmem:[#allocation8 + $0xe0] sm:$0xff]  ;;  %v335_v14 = vld [vmem:[#allocation10 + $0x8] sm:$0xff] }
  0x7f   :  { %732 = vmatprep.subr.bf16.mxu0 %v1043_v0  ;;  %757 = vmatprep.subr.bf16.mxu1 %v756_v38  ;;  %v242_v11 = vld [vmem:[#allocation8 + $0xf0] sm:$0xff]  ;;  %v334_v13 = vld [vmem:[#allocation10] sm:$0xff]  ;;  %v337_v17 = vld [vmem:[#allocation10 + $0x18] sm:$0xff] }
  0x80   :  { %v774_v12 = vpack.c.bf16 %v242_v11, %v240_v10  ;;  %v336_v15 = vld [vmem:[#allocation10 + $0x10] sm:$0xff]  ;;  %v777_v16 = vpack.c.bf16 %v335_v14, %v334_v13  ;;  %v338_v19 = vld [vmem:[#allocation10 + $0x20] sm:$0xff]  ;;  %v339_v20 = vld [vmem:[#allocation10 + $0x28] sm:$0xff] }
  0x81   :  { %v780_v18 = vpack.c.bf16 %v337_v17, %v336_v15  ;;  %v783_v21 = vpack.c.bf16 %v339_v20, %v338_v19  ;;  %v560_v22 = vld [vmem:[%s1280_s3] ss:$0 sm:$0xff]  ;;  %v341_v28 = vld [vmem:[#allocation10 + $0x38] sm:$0xff]  ;;  %v342_v30 = vld [vmem:[#allocation10 + $0x40] sm:$0xff] }
  0x82   :  { %734 = vmatpush3.bf16.msra.mxu0 %v733_v36  ;;  %759 = vmatpush1.bf16.msra.mxu1 %v758_v44  ;;  %v340_v27 = vld [vmem:[#allocation10 + $0x30] sm:$0xff]  ;;  %v343_v31 = vld [vmem:[#allocation10 + $0x48] sm:$0xff]  ;;  %v345_v34 = vld [vmem:[#allocation10 + $0x58] sm:$0xff] }
  0x83   :  { %735 = vmatprep.subr.bf16.mxu0 %v1043_v0  ;;  %761 = vmatprep.subr.bf16.mxu1 %v760_v47  ;;  %v786_v29 = vpack.c.bf16 %v341_v28, %v340_v27  ;;  %v789_v32 = vpack.c.bf16 %v343_v31, %v342_v30  ;;  %v344_v33 = vld [vmem:[#allocation10 + $0x50] sm:$0xff]  ;;  %v346_v36 = vld [vmem:[#allocation10 + $0x60] sm:$0xff]  ;;  %v347_v37 = vld [vmem:[#allocation10 + $0x68] sm:$0xff] }
  0x84   :  { %v792_v35 = vpack.c.bf16 %v345_v34, %v344_v33  ;;  %v795_v38 = vpack.c.bf16 %v347_v37, %v346_v36  ;;  %v349_v39 = vld [vmem:[#allocation10 + $0x78] sm:$0xff]  ;;  %v428_v41 = vld [vmem:[#allocation11] sm:$0xff]  ;;  %v429_v42 = vld [vmem:[#allocation11 + $0x8] sm:$0xff] }
  0x85   :  { %v430_v43 = vld [vmem:[#allocation11 + $0x10] sm:$0xff]  ;;  %v801_v44 = vpack.c.bf16 %v429_v42, %v428_v41  ;;  %v432_v47 = vld [vmem:[#allocation11 + $0x20] sm:$0xff]  ;;  %v433_v48 = vld [vmem:[#allocation11 + $0x28] sm:$0xff] }
  0x86   :  { %737 = vmatpush3.bf16.msra.mxu0 %v736_v45  ;;  %763 = vmatpush1.bf16.msra.mxu1 %v762_v53  ;;  %v431_v45 = vld [vmem:[#allocation11 + $0x18] sm:$0xff]  ;;  %v807_v49 = vpack.c.bf16 %v433_v48, %v432_v47  ;;  %v434_v50 = vld [vmem:[#allocation11 + $0x30] sm:$0xff]  ;;  %v436_v53 = vld [vmem:[#allocation11 + $0x40] sm:$0xff] }
  0x87   :  { %738 = vmatprep.subr.bf16.mxu0 %v1043_v0  ;;  %765 = vmatprep.subr.bf16.mxu1 %v764_v56  ;;  %v804_v46 = vpack.c.bf16 %v431_v45, %v430_v43  ;;  %v435_v51 = vld [vmem:[#allocation11 + $0x38] sm:$0xff]  ;;  %v438_v56 = vld [vmem:[#allocation11 + $0x50] sm:$0xff]  ;;  %v440_v59 = vld [vmem:[#allocation11 + $0x60] sm:$0xff] }
  0x88   :  { %v810_v52 = vpack.c.bf16 %v435_v51, %v434_v50  ;;  %v439_v57 = vld [vmem:[#allocation11 + $0x58] sm:$0xff]  ;;  %v441_v60 = vld [vmem:[#allocation11 + $0x68] sm:$0xff]  ;;  %v244_v3 = vld [vmem:[%s1282_s5] sm:$0x3] }
  0x89   :  { %v816_v58 = vpack.c.bf16 %v439_v57, %v438_v56  ;;  %v819_v61 = vpack.c.bf16 %v441_v60, %v440_v59  ;;  %v442_v15 = vld [vmem:[#allocation11 + $0x70] sm:$0xff] }
  0x8a   :  { %740 = vmatpush3.bf16.msra.mxu0 %v739_v54  ;;  %767 = vmatpush1.bf16.msra.mxu1 %v766_v62  ;;  %v437_v54 = vld [vmem:[#allocation11 + $0x48] sm:$0xff]  ;;  %v246_v62 = vlaneseq }
  0x8b   :  { %741 = vmatprep.subr.bf16.mxu0 %v1043_v0  ;;  %769 = vmatprep.subr.bf16.mxu1 %v768_v2  ;;  %v813_v55 = vpack.c.bf16 %v437_v54, %v436_v53 }
  0x8e   :  { %743 = vmatpush3.bf16.msra.mxu0 %v742_v63  ;;  %771 = vmatpush1.bf16.msra.mxu1 %v770_v5  ;;  %v247_v63 = vshrl.u32 %v246_v62, 7 }
  0x8f   :  { %776 = vmatprep.subr.bf16.mxu0 %v1043_v0  ;;  %773 = vmatprep.subr.bf16.mxu1 %v772_v9 }
  0x90   :  { %v248_v2 = vsub.s32 0, %v247_v63  ;;  %v252_v4 = vsub.s32 1, %v247_v63 }
  0x91   :  { %648 = vmatmul.mubr.f32.vlgmr.msra.gmra.mrb[0].mxu0 %v117_v6 }
  0x92   :  { %682 = vmatprep.mubr.msk.f32.mxu0 %vm1044_vm0, %v1045_v1  ;;  %775 = vmatpush1.bf16.msra.mxu1 %v774_v12  ;;  %v249_v5 = vrot.slane %v244_v3, %v248_v2  ;;  %v253_v6 = vrot.slane %v244_v3, %v252_v4  ;;  %v329_v12 = vld [vmem:[#allocation5] sm:$0xff] }
  0x93   :  { %800 = vmatprep.subr.bf16.mxu1 %v1043_v0  ;;  %778 = vmatpush3.bf16.msra.mxu0 %v777_v16  ;;  %v443_v16 = vld [vmem:[#allocation11 + $0x78] sm:$0xff] }
  0x94   :  { %779 = vmatprep.subr.bf16.mxu0 %v1043_v0  ;;  %v822_v17 = vpack.c.bf16 %v443_v16, %v442_v15 }
  0x97   :  { %781 = vmatpush3.bf16.msra.mxu0 %v780_v18  ;;  %v561_v18 = vld [vmem:[%s1284_s7] ss:$0 sm:$0xff] }
  0x98   :  { %782 = vmatprep.subr.bf16.mxu0 %v1043_v0 }
  0x9b   :  { %784 = vmatpush3.bf16.msra.mxu0 %v783_v21 }
  0x9c   :  { %785 = vmatprep.subr.bf16.mxu0 %v1043_v0 }
  0x9f   :  { %787 = vmatpush3.bf16.msra.mxu0 %v786_v29 }
  0xa0   :  { %788 = vmatprep.subr.bf16.mxu0 %v1043_v0 }
  0xa3   :  { %790 = vmatpush3.bf16.msra.mxu0 %v789_v32 }
  0xa4   :  { %791 = vmatprep.subr.bf16.mxu0 %v1043_v0 }
  0xa7   :  { %793 = vmatpush3.bf16.msra.mxu0 %v792_v35 }
  0xa8   :  { %794 = vmatprep.subr.bf16.mxu0 %v1043_v0 }
  0xab   :  { %796 = vmatpush3.bf16.msra.mxu0 %v795_v38 }
  0xac   :  { %797 = vmatprep.subr.bf16.mxu0 %v1043_v0 }
 0x164   :  { %v207_v23 = vpop.f32.mrb[0].mxu0 }
 0x165   :  { %v208_v24 = vadd.f32 %v560_v22, %v207_v23  ;;  %v649_v25 = vpop.f32.mrb[1].mxu0 }
 0x167   :  { %v211_v26 = vmax.f32 %v208_v24, 0.0 }
 0x169   :  { %321 = vmatmul.mubr.f32.vlgmr.msra.gmra.mrb[0].mxu1 %v211_v26 }
 0x16a   :  { %717 = vmatprep.mubr.msk.f32.mxu1 %vm1044_vm0, %v1045_v1  ;;  %v348_v1 = vld [vmem:[#allocation10 + $0x70] sm:$0xff]  ;;  %802 = vmatpush3.bf16.msra.mxu1 %v801_v44 }
 0x16b   :  { %v798_v40 = vpack.c.bf16 %v349_v39, %v348_v1  ;;  %803 = vmatprep.subr.bf16.mxu1 %v1043_v0 }
 0x16d   :  { %799 = vmatpush3.bf16.msra.mxu0 %v798_v40 }
 0x16e   :  { %805 = vmatpush3.bf16.msra.mxu1 %v804_v46 }
 0x16f   :  { %806 = vmatprep.subr.bf16.mxu1 %v1043_v0 }
 0x172   :  { %808 = vmatpush3.bf16.msra.mxu1 %v807_v49 }
 0x173   :  { %809 = vmatprep.subr.bf16.mxu1 %v1043_v0 }
 0x176   :  { %811 = vmatpush3.bf16.msra.mxu1 %v810_v52 }
 0x177   :  { %812 = vmatprep.subr.bf16.mxu1 %v1043_v0 }
 0x17a   :  { %814 = vmatpush3.bf16.msra.mxu1 %v813_v55 }
 0x17b   :  { %815 = vmatprep.subr.bf16.mxu1 %v1043_v0 }
 0x17e   :  { %817 = vmatpush3.bf16.msra.mxu1 %v816_v58 }
 0x17f   :  { %818 = vmatprep.subr.bf16.mxu1 %v1043_v0 }
 0x182   :  { %820 = vmatpush3.bf16.msra.mxu1 %v819_v61 }
 0x183   :  { %821 = vmatprep.subr.bf16.mxu1 %v1043_v0 }
 0x186   :  { %823 = vmatpush3.bf16.msra.mxu1 %v822_v17 }
 0x23c   :  { %v322_v7 = vpop.f32.mrb[0].mxu1 }
 0x23d   :  { %v323_v8 = vadd.f32 %v322_v7, %v249_v5  ;;  %v324_v9 = vpop.f32.mrb[1].mxu1 }
 0x23e   :  { %v325_v10 = vadd.f32 %v324_v9, %v253_v6 }
 0x23f   :  { %327 = vst [vmem:[#allocation14] sm:$0xff] %v323_v8 }
 0x240   :  { %328 = vst [vmem:[#allocation14 + $0x8] sm:$0xff] %v325_v10  ;;  %v330_v11 = vmul.f32 1.442695, %v325_v10 }
 0x242   :  { %839 = vpow2.f32 %v330_v11 }
 0x24c   :  { %v840_v0 = vpop.eup %839 }
 0x24d   :  { %v332_v13 = vmul.f32 %v840_v0, %v329_v12 }
 0x24f   :  { %v333_v14 = vadd.f32 %v332_v13, %v323_v8 }
 0x251   :  { %683 = vmatmul.mubr.f32.vlgmr.msra.gmra.mrb[2].mxu0 %v333_v14 }
 0x324   :  { %v423_v19 = vpop.f32.mrb[2].mxu0 }
 0x325   :  { %v424_v20 = vadd.f32 %v561_v18, %v423_v19  ;;  %v684_v21 = vpop.f32.mrb[3].mxu0 }
 0x327   :  { %v427_v22 = vmax.f32 %v424_v20, 0.0 }
 0x329   :  { %718 = vmatmul.mubr.f32.vlgmr.msra.gmra.mrb[2].mxu1 %v427_v22 }
 0x32a   :  { %988 = shalt.err (!%p985_p10)
}
 0x32b   :  { %s989_s16 = scalar_lea.hbm %s1288_s11, 256 }
 0x32c   :  { %p990_p11 = scmp.ne.s32.totalorder %s1288_s11, %s989_s16  ;;  %p993_p12 = scmp.lt.u32.totalorder %s989_s16, %s1288_s11 }
 0x32e   :  { %p995_p13 = pnand %p993_p12, %p990_p11 }
 0x330   :  { %998 = shalt.err (!%p995_p13)
}
 0x331   :  { %547 = dma.vmem_to_hbm [thread:$0]  %s545_s14, 256, %s1288_s11, [#allocation15]   ;;  %v562_v23 = vld [vmem:[%s1286_s9] ss:$0 sm:$0xff] }
 0x332   :  { %s1047_s22 = smov [#allocation13]  }
 0x333   :  { %s534_s23 = sshll.u32 %s1047_s22, 4  ;;  %s535_s23 = int_to_ptr.vmem [resolvable:$true] %s534_s23 }
 0x334   :  { %s999_s24 = scalar_lea.vmem %s535_s23, 128  ;;  %p1004_p1 = scmp.lt.s32.totalorder %s535_s23, %s535_s23 }
 0x335   :  { %p1000_p0 = scmp.ne.s32.totalorder %s535_s23, %s999_s24  ;;  %p1005_p2 = scmp.lt.s32.totalorder %s999_s24, %s999_s24 }
 0x337   :  { %p1006_p3 = por %p1005_p2, %p1004_p1 }
 0x339   :  { %p1007_p4 = pnand %p1006_p3, %p1000_p0 }
 0x3fc   :  { %v517_v24 = vpop.f32.mrb[2].mxu1 }
 0x3fd   :  { %v518_v25 = vadd.f32 %v562_v23, %v517_v24  ;;  %v719_v26 = vpop.f32.mrb[3].mxu1 }
 0x3ff   :  { %v563_v27 = vmul.f32 -1.442695, %v518_v25 }
 0x401   :  { %841 = vpow2.f32 %v563_v27 }
 0x40b   :  { %v842_v28 = vpop.eup %841 }
 0x40c   :  { %v524_v29 = vadd.f32 1.0, %v842_v28 }
 0x40e   :  { %843 = vrcp.f32 %v524_v29 }
 0x418   :  { %v844_v30 = vpop.eup %843 }
 0x419   :  { %527 = vst [vmem:[#allocation13] sm:$0xff] %v844_v30 }
 0x41a   :  { %1010 = shalt.err (!%p1007_p4)
}
 0x41b   :  { %s1011_s26 = scalar_lea.hbm %s1287_s10, 128 }
 0x41c   :  { %p1012_p5 = scmp.ne.s32.totalorder %s1287_s10, %s1011_s26  ;;  %p1015_p6 = scmp.lt.u32.totalorder %s1011_s26, %s1287_s10 }
 0x41e   :  { %p1017_p7 = pnand %p1015_p6, %p1012_p5 }
 0x420   :  { %1020 = shalt.err (!%p1017_p7)
}
 0x421   :  { %537 = dma.vmem_to_hbm [thread:$0]  %s535_s23, 128, %s1287_s10, [#allocation4]  }
 0x422   :  { %1029 = dma.done.wait [#allocation4], 128  }
 0x423   :  { %1030 = vsyncadd [#allocation4], 4294967168 }
 0x424   :  { %1031 = dma.done.wait [#allocation15], 256  }
 0x425   :  { %1032 = vsyncadd [#allocation15], 4294967040 }
 0x426   :  { %554 = vsyncpa [#allocation3], 1 }
 0x427   :  { %555 = vsyncpa [#allocation6], 1 }
 0x428   :  { %556 = vsyncpa [#allocation9], 1 }
 0x429   :  { %557 = vsyncpa [#allocation12], 1 }
 0x42a   :  { %558 = vsyncpa [#allocation4], 1 }
 0x42b   :  { %559 = vsyncpa [#allocation15], 1 }

</bundles_post_ra>
